<compile_context>
chip_gen: v7x
topology: tpu7x:2x2x1
jax: 0.10.0
libtpu: 0.0.40
codegen_flags: <defaults>
</compile_context>

<pallas_src>
import numpy as np
import jax
import jax.numpy as jnp
from jax import lax
from jax.experimental import pallas as pl
from jax.experimental.pallas import tpu as pltpu

# ---- model config (small, structurally consistent with the module) ----
DIM        = 32
DIM_HEAD   = 16
HEADS      = 4
FF_MULT    = 4
ATTN_INNER = DIM_HEAD * HEADS            # 64
FF_INNER   = DIM * FF_MULT               # 128
FUSED_OUT  = ATTN_INNER + 2 * DIM_HEAD + 2 * FF_INNER   # 352
XPOS_SCALE_BASE = 512
LN_EPS = 1e-5


# ----------------------------- Pallas kernel -----------------------------
def transformer_block_kernel(x_ref, gamma_ref, wf_ref, wao_ref, wfo_ref,
                             cq_ref, sq_ref, ck_ref, sk_ref, o_ref):
    B, N, D = x_ref.shape
    R = B * N
    half = DIM_HEAD // 2

    # ---- LayerNorm (beta == 0), f32, batch folded into rows ----
    x = x_ref[...].reshape(R, D)
    mu  = jnp.mean(x, axis=-1, keepdims=True)
    var = jnp.mean((x - mu) ** 2, axis=-1, keepdims=True)
    xn  = (x - mu) * lax.rsqrt(var + LN_EPS) * gamma_ref[...]          # (R, D)

    # ---- single fused lane-dense projection (bf16 operands, f32 accumulation) ----
    proj = jnp.dot(xn.astype(jnp.bfloat16), wf_ref[...],
                   preferred_element_type=jnp.float32)                 # (R, 352)
    o_q = ATTN_INNER
    o_k = o_q + DIM_HEAD
    o_v = o_k + DIM_HEAD
    o_f = o_v + FF_INNER
    qf  = proj[:, :o_q]          # (R, H*dh)   h-major lanes
    kf  = proj[:, o_q:o_k]       # (R, dh)
    vf  = proj[:, o_k:o_v]       # (R, dh)
    ffx = proj[:, o_v:o_f]       # (R, FF_INNER)   SwiGLU x
    ffg = proj[:, o_f:]          # (R, FF_INNER)   SwiGLU gate

    def half_swap(t):            # rotate_half; the sign flip is folded into the sin tables
        return jnp.concatenate([t[..., half:], t[..., :half]], axis=-1)

    # ---- rearrange 'b n (h d) -> (h b) n d' via lane slices (no minor-dim reshape) ----
    qB = jnp.concatenate(
        [qf[:, h * DIM_HEAD:(h + 1) * DIM_HEAD].reshape(B, N, DIM_HEAD)
         for h in range(HEADS)], axis=0)                               # (H*B, N, dh)
    k3 = kf.reshape(B, N, DIM_HEAD)
    v3 = vf.reshape(B, N, DIM_HEAD)

    # ---- xpos rotary: tables carry xpos scale, softmax scale and rotate_half sign ----
    qB = qB * cq_ref[...][None] + half_swap(qB) * sq_ref[...][None]
    k3 = k3 * ck_ref[...][None] + half_swap(k3) * sk_ref[...][None]
    kB = jnp.tile(k3, (HEADS, 1, 1))        # multi-query: k/v shared across heads
    vB = jnp.tile(v3, (HEADS, 1, 1))

    # ---- causal attention, (heads * batch) batched on the MXU ----
    sim = jnp.einsum('bqd,bkd->bqk',
                     qB.astype(jnp.bfloat16), kB.astype(jnp.bfloat16),
                     preferred_element_type=jnp.float32)               # (H*B, N, N)
    row = lax.broadcasted_iota(jnp.int32, (N, N), 0)
    col = lax.broadcasted_iota(jnp.int32, (N, N), 1)
    sim = jnp.where((col > row)[None], -jnp.finfo(jnp.float32).max, sim)
    sim = sim - jnp.max(sim, axis=-1, keepdims=True)
    p = jnp.exp(sim)
    p = p * pl.reciprocal(jnp.sum(p, axis=-1, keepdims=True), approx=True)
    outB = jnp.einsum('bqk,bkd->bqd',
                      p.astype(jnp.bfloat16), vB.astype(jnp.bfloat16),
                      preferred_element_type=jnp.float32)              # (H*B, N, dh)

    # ---- rearrange '(h b) n d -> (b n) (h d)' via lane concat, then ONE attn_out matmul ----
    out4 = outB.reshape(HEADS, B, N, DIM_HEAD)
    out_flat = jnp.concatenate([out4[h] for h in range(HEADS)],
                               axis=-1).reshape(R, ATTN_INNER)         # (R, H*dh)
    attn_out = jnp.dot(out_flat.astype(jnp.bfloat16), wao_ref[...],
                       preferred_element_type=jnp.float32)             # (R, D)

    # ---- SwiGLU feed-forward (f32 elementwise, bf16 matmul operands) ----
    swiglu = jax.nn.silu(ffg) * ffx
    ff_out = jnp.dot(swiglu.astype(jnp.bfloat16), wfo_ref[...],
                     preferred_element_type=jnp.float32)               # (R, D)

    # NOTE: output last dim D=32 (<128) -> masked store; relayouting to a lane-dense
    # (B, N*D) slab would require an in-kernel lane relayout of comparable cost at
    # this toy size, so the module's natural (B, N, D) layout is kept.
    o_ref[...] = (attn_out + ff_out).reshape(B, N, D).astype(o_ref.dtype)


# ----------------------------- glue (plain JAX) -----------------------------
def rotary_tables(n, dim_head, scale_base, use_xpos=True):
    """xpos rotary tables, matching lucidrains RotaryEmbedding / apply_rotary_pos_emb."""
    inv_freq = 1.0 / (10000.0 ** (jnp.arange(0, dim_head, 2, dtype=jnp.float32) / dim_head))
    t = jnp.arange(n, dtype=jnp.float32)
    freqs = t[:, None] * inv_freq[None, :]
    freqs = jnp.concatenate([freqs, freqs], axis=-1)                     # (n, dh)
    if use_xpos:
        power = (t - (n // 2)) / scale_base
        base = (jnp.arange(0, dim_head, 2, dtype=jnp.float32) + 0.4 * dim_head) / (1.4 * dim_head)
        scl = base[None, :] ** power[:, None]
        scl = jnp.concatenate([scl, scl], axis=-1)                       # (n, dh)
    else:
        scl = jnp.ones((n, dim_head), jnp.float32)
    return jnp.cos(freqs), jnp.sin(freqs), scl, 1.0 / scl


def init_params(key):
    k0, k1, k2 = jax.random.split(key, 3)
    s = 0.05
    gamma      = jnp.ones((1, DIM), jnp.float32)                               # LayerNorm.gamma
    w_fused    = jax.random.normal(k0, (DIM, FUSED_OUT), jnp.float32) * s      # fused_attn_ff_proj
    w_attn_out = jax.random.normal(k1, (ATTN_INNER, DIM), jnp.float32) * s     # attn_out
    w_ff_out   = jax.random.normal(k2, (FF_INNER, DIM), jnp.float32) * s       # ff_out[-1]
    return gamma, w_fused, w_attn_out, w_ff_out


def transformer_block(x, gamma, w_fused, w_attn_out, w_ff_out):
    B, N, D = x.shape
    assert D == DIM

    cos, sin, scl, iscl = rotary_tables(N, DIM_HEAD, XPOS_SCALE_BASE, use_xpos=True)
    sign = jnp.concatenate([-jnp.ones((DIM_HEAD // 2,), jnp.float32),
                            jnp.ones((DIM_HEAD // 2,), jnp.float32)])[None, :]
    attn_scale = DIM_HEAD ** -0.5
    # q tables: xpos scale, softmax scale (exact power of 2) and rotate_half sign folded in
    cq = cos * scl * attn_scale
    sq = sin * scl * sign * attn_scale
    # k tables: xpos scale**-1 and rotate_half sign folded in
    ck = cos * iscl
    sk = sin * iscl * sign

    vmem = pl.BlockSpec(memory_space=pltpu.MemorySpace.VMEM)   # whole array resident in VMEM

    return pl.pallas_call(
        transformer_block_kernel,
        out_shape=jax.ShapeDtypeStruct((B, N, D), jnp.float32),
        in_specs=[vmem] * 9,
        out_specs=vmem,
    )(x, gamma,
      w_fused.astype(jnp.bfloat16),      # single (32, 352) fused weight
      w_attn_out.astype(jnp.bfloat16),   # (64, 32)
      w_ff_out.astype(jnp.bfloat16),     # (128, 32)
      cq, sq, ck, sk)


# ----------------------------- pure-JAX reference -----------------------------
def reference(x, gamma, w_fused, w_attn_out, w_ff_out):
    B, N, D = x.shape
    mu  = jnp.mean(x, -1, keepdims=True)
    var = jnp.mean((x - mu) ** 2, -1, keepdims=True)
    xn  = (x - mu) / jnp.sqrt(var + LN_EPS) * gamma[0]
    proj = xn @ w_fused
    q  = proj[..., :ATTN_INNER]
    k  = proj[..., ATTN_INNER:ATTN_INNER + DIM_HEAD]
    v  = proj[..., ATTN_INNER + DIM_HEAD:ATTN_INNER + 2 * DIM_HEAD]
    ff = proj[..., ATTN_INNER + 2 * DIM_HEAD:]
    q = q.reshape(B, N, HEADS, DIM_HEAD).transpose(0, 2, 1, 3)       # b h n d
    cos, sin, scl, iscl = rotary_tables(N, DIM_HEAD, XPOS_SCALE_BASE, True)

    def rot_half(t):
        t1, t2 = jnp.split(t, 2, axis=-1)
        return jnp.concatenate([-t2, t1], axis=-1)

    q = q * cos * scl + rot_half(q) * sin * scl
    k = k * cos * iscl + rot_half(k) * sin * iscl
    sim = jnp.einsum('bhid,bjd->bhij', q, k) * DIM_HEAD ** -0.5
    mask = jnp.triu(jnp.ones((N, N), bool), 1)
    sim = jnp.where(mask, -jnp.finfo(jnp.float32).max, sim)
    attn = jax.nn.softmax(sim, axis=-1)
    out = jnp.einsum('bhij,bjd->bhid', attn, v)
    out = out.transpose(0, 2, 1, 3).reshape(B, N, ATTN_INNER)
    attn_out = out @ w_attn_out
    ffx, ffg = jnp.split(ff, 2, axis=-1)
    ff_out = (jax.nn.silu(ffg) * ffx) @ w_ff_out
    return attn_out + ff_out


if __name__ == "__main__":
    key = jax.random.PRNGKey(0)
    kx, kp = jax.random.split(key)
    B, N = 2, 8
    x = jax.random.normal(kx, (B, N, DIM), jnp.float32)
    gamma, w_fused, w_attn_out, w_ff_out = init_params(kp)

    out = transformer_block(x, gamma, w_fused, w_attn_out, w_ff_out)
    out = jax.block_until_ready(out)

    ref = reference(x, gamma, w_fused, w_attn_out, w_ff_out)
    assert out.shape == (B, N, DIM)
    np.testing.assert_allclose(np.asarray(out), np.asarray(ref), atol=2e-2, rtol=2e-2)
    print("KERNEL_OK")
</pallas_src>

<mosaic_0001>
module attributes {stable_mosaic.version = 11 : i64} {
  func.func @transformer_block_kernel(%arg0: memref<2x8x32xf32, #tpu.memory_space<vmem>>, %arg1: memref<1x32xf32, #tpu.memory_space<vmem>>, %arg2: memref<32x352xbf16, #tpu.memory_space<vmem>>, %arg3: memref<64x32xbf16, #tpu.memory_space<vmem>>, %arg4: memref<128x32xbf16, #tpu.memory_space<vmem>>, %arg5: memref<8x16xf32, #tpu.memory_space<vmem>>, %arg6: memref<8x16xf32, #tpu.memory_space<vmem>>, %arg7: memref<8x16xf32, #tpu.memory_space<vmem>>, %arg8: memref<8x16xf32, #tpu.memory_space<vmem>>, %arg9: memref<2x8x32xf32, #tpu.memory_space<vmem>>) attributes {dimension_semantics = [], scalar_prefetch = 0 : i64, scratch_operands = 0 : i64, tpu.core_type = #tpu.core_type<tc>} {
    %c0 = arith.constant 0 : index
    %c0_0 = arith.constant 0 : index
    %c0_1 = arith.constant 0 : index
    %0 = vector.load %arg0[%c0, %c0_0, %c0_1] : memref<2x8x32xf32, #tpu.memory_space<vmem>>, vector<2x8x32xf32>
    %1 = vector.shape_cast %0 : vector<2x8x32xf32> to vector<16x32xf32>
    %cst = arith.constant dense<0.000000e+00> : vector<16xf32>
    %2 = vector.multi_reduction <add>, %1, %cst [1] : vector<16x32xf32> to vector<16xf32>
    %3 = vector.shape_cast %2 : vector<16xf32> to vector<16x1xf32>
    %cst_2 = arith.constant 3.200000e+01 : f32
    %4 = vector.broadcast %cst_2 : f32 to vector<16x1xf32>
    %5 = arith.divf %3, %4 : vector<16x1xf32>
    %6 = vector.broadcast %5 : vector<16x1xf32> to vector<16x32xf32>
    %7 = arith.subf %1, %6 : vector<16x32xf32>
    %8 = arith.mulf %7, %7 : vector<16x32xf32>
    %cst_3 = arith.constant dense<0.000000e+00> : vector<16xf32>
    %9 = vector.multi_reduction <add>, %8, %cst_3 [1] : vector<16x32xf32> to vector<16xf32>
    %10 = vector.shape_cast %9 : vector<16xf32> to vector<16x1xf32>
    %cst_4 = arith.constant 3.200000e+01 : f32
    %11 = vector.broadcast %cst_4 : f32 to vector<16x1xf32>
    %12 = arith.divf %10, %11 : vector<16x1xf32>
    %13 = vector.broadcast %5 : vector<16x1xf32> to vector<16x32xf32>
    %14 = arith.subf %1, %13 : vector<16x32xf32>
    %cst_5 = arith.constant 9.99999974E-6 : f32
    %15 = vector.broadcast %cst_5 : f32 to vector<16x1xf32>
    %16 = arith.addf %12, %15 : vector<16x1xf32>
    %17 = math.rsqrt %16 : vector<16x1xf32>
    %18 = vector.broadcast %17 : vector<16x1xf32> to vector<16x32xf32>
    %19 = arith.mulf %14, %18 : vector<16x32xf32>
    %c0_6 = arith.constant 0 : index
    %c0_7 = arith.constant 0 : index
    %20 = vector.load %arg1[%c0_6, %c0_7] : memref<1x32xf32, #tpu.memory_space<vmem>>, vector<1x32xf32>
    %21 = vector.broadcast %20 : vector<1x32xf32> to vector<16x32xf32>
    %22 = arith.mulf %19, %21 : vector<16x32xf32>
    %23 = arith.truncf %22 : vector<16x32xf32> to vector<16x32xbf16>
    %c0_8 = arith.constant 0 : index
    %c0_9 = arith.constant 0 : index
    %24 = vector.load %arg2[%c0_8, %c0_9] : memref<32x352xbf16, #tpu.memory_space<vmem>>, vector<32x352xbf16>
    %cst_10 = arith.constant dense<0.000000e+00> : vector<16x352xf32>
    %25 = tpu.matmul %23, %24, %cst_10 {dimension_numbers = #tpu.dot_dimension_numbers<[1], [0], [0], [1], [0, 0, 1, 1], [], []>} : vector<16x32xbf16>, vector<32x352xbf16>, vector<16x352xf32> -> vector<16x352xf32>
    %26 = vector.extract_strided_slice %25 {offsets = [0, 0], sizes = [16, 64], strides = [1, 1]} : vector<16x352xf32> to vector<16x64xf32>
    %27 = vector.extract_strided_slice %25 {offsets = [0, 64], sizes = [16, 16], strides = [1, 1]} : vector<16x352xf32> to vector<16x16xf32>
    %28 = vector.extract_strided_slice %25 {offsets = [0, 80], sizes = [16, 16], strides = [1, 1]} : vector<16x352xf32> to vector<16x16xf32>
    %29 = vector.extract_strided_slice %25 {offsets = [0, 96], sizes = [16, 128], strides = [1, 1]} : vector<16x352xf32> to vector<16x128xf32>
    %30 = vector.extract_strided_slice %25 {offsets = [0, 224], sizes = [16, 128], strides = [1, 1]} : vector<16x352xf32> to vector<16x128xf32>
    %31 = vector.extract_strided_slice %26 {offsets = [0, 0], sizes = [16, 16], strides = [1, 1]} : vector<16x64xf32> to vector<16x16xf32>
    %32 = vector.shape_cast %31 : vector<16x16xf32> to vector<2x8x16xf32>
    %33 = vector.extract_strided_slice %26 {offsets = [0, 16], sizes = [16, 16], strides = [1, 1]} : vector<16x64xf32> to vector<16x16xf32>
    %34 = vector.shape_cast %33 : vector<16x16xf32> to vector<2x8x16xf32>
    %35 = vector.extract_strided_slice %26 {offsets = [0, 32], sizes = [16, 16], strides = [1, 1]} : vector<16x64xf32> to vector<16x16xf32>
    %36 = vector.shape_cast %35 : vector<16x16xf32> to vector<2x8x16xf32>
    %37 = vector.extract_strided_slice %26 {offsets = [0, 48], sizes = [16, 16], strides = [1, 1]} : vector<16x64xf32> to vector<16x16xf32>
    %38 = vector.shape_cast %37 : vector<16x16xf32> to vector<2x8x16xf32>
    %39 = tpu.concatenate %32, %34, %36, %38 in 0 : vector<2x8x16xf32>, vector<2x8x16xf32>, vector<2x8x16xf32>, vector<2x8x16xf32> -> vector<8x8x16xf32>
    %40 = vector.shape_cast %27 : vector<16x16xf32> to vector<2x8x16xf32>
    %41 = vector.shape_cast %28 : vector<16x16xf32> to vector<2x8x16xf32>
    %c0_11 = arith.constant 0 : index
    %c0_12 = arith.constant 0 : index
    %42 = vector.load %arg5[%c0_11, %c0_12] : memref<8x16xf32, #tpu.memory_space<vmem>>, vector<8x16xf32>
    %43 = vector.shape_cast %42 : vector<8x16xf32> to vector<1x8x16xf32>
    %44 = vector.broadcast %43 : vector<1x8x16xf32> to vector<8x8x16xf32>
    %45 = arith.mulf %39, %44 : vector<8x8x16xf32>
    %46 = vector.extract_strided_slice %39 {offsets = [0, 0, 8], sizes = [8, 8, 8], strides = [1, 1, 1]} : vector<8x8x16xf32> to vector<8x8x8xf32>
    %47 = vector.extract_strided_slice %39 {offsets = [0, 0, 0], sizes = [8, 8, 8], strides = [1, 1, 1]} : vector<8x8x16xf32> to vector<8x8x8xf32>
    %48 = tpu.concatenate %46, %47 in 2 : vector<8x8x8xf32>, vector<8x8x8xf32> -> vector<8x8x16xf32>
    %c0_13 = arith.constant 0 : index
    %c0_14 = arith.constant 0 : index
    %49 = vector.load %arg6[%c0_13, %c0_14] : memref<8x16xf32, #tpu.memory_space<vmem>>, vector<8x16xf32>
    %50 = vector.shape_cast %49 : vector<8x16xf32> to vector<1x8x16xf32>
    %51 = vector.broadcast %50 : vector<1x8x16xf32> to vector<8x8x16xf32>
    %52 = arith.mulf %48, %51 : vector<8x8x16xf32>
    %53 = arith.addf %45, %52 : vector<8x8x16xf32>
    %c0_15 = arith.constant 0 : index
    %c0_16 = arith.constant 0 : index
    %54 = vector.load %arg7[%c0_15, %c0_16] : memref<8x16xf32, #tpu.memory_space<vmem>>, vector<8x16xf32>
    %55 = vector.shape_cast %54 : vector<8x16xf32> to vector<1x8x16xf32>
    %56 = vector.broadcast %55 : vector<1x8x16xf32> to vector<2x8x16xf32>
    %57 = arith.mulf %40, %56 : vector<2x8x16xf32>
    %58 = vector.extract_strided_slice %40 {offsets = [0, 0, 8], sizes = [2, 8, 8], strides = [1, 1, 1]} : vector<2x8x16xf32> to vector<2x8x8xf32>
    %59 = vector.extract_strided_slice %40 {offsets = [0, 0, 0], sizes = [2, 8, 8], strides = [1, 1, 1]} : vector<2x8x16xf32> to vector<2x8x8xf32>
    %60 = tpu.concatenate %58, %59 in 2 : vector<2x8x8xf32>, vector<2x8x8xf32> -> vector<2x8x16xf32>
    %c0_17 = arith.constant 0 : index
    %c0_18 = arith.constant 0 : index
    %61 = vector.load %arg8[%c0_17, %c0_18] : memref<8x16xf32, #tpu.memory_space<vmem>>, vector<8x16xf32>
    %62 = vector.shape_cast %61 : vector<8x16xf32> to vector<1x8x16xf32>
    %63 = vector.broadcast %62 : vector<1x8x16xf32> to vector<2x8x16xf32>
    %64 = arith.mulf %60, %63 : vector<2x8x16xf32>
    %65 = arith.addf %57, %64 : vector<2x8x16xf32>
    %66 = tpu.concatenate %65, %65, %65, %65 in 0 : vector<2x8x16xf32>, vector<2x8x16xf32>, vector<2x8x16xf32>, vector<2x8x16xf32> -> vector<8x8x16xf32>
    %67 = tpu.concatenate %41, %41, %41, %41 in 0 : vector<2x8x16xf32>, vector<2x8x16xf32>, vector<2x8x16xf32>, vector<2x8x16xf32> -> vector<8x8x16xf32>
    %68 = arith.truncf %53 : vector<8x8x16xf32> to vector<8x8x16xbf16>
    %69 = arith.truncf %66 : vector<8x8x16xf32> to vector<8x8x16xbf16>
    "tpu.trace_start"() <{level = 10 : i32, message = "bqd,bkd->bqk"}> : () -> ()
    %cst_19 = arith.constant dense<0.000000e+00> : vector<8x8x8xf32>
    %70 = tpu.matmul %68, %69, %cst_19 {dimension_numbers = #tpu.dot_dimension_numbers<[2], [2], [1], [1], [0, 0, 0, 1, 1, 1], [0], [0]>} : vector<8x8x16xbf16>, vector<8x8x16xbf16>, vector<8x8x8xf32> -> vector<8x8x8xf32>
    "tpu.trace_stop"() : () -> ()
    %71 = tpu.iota {dimensions = array<i32: 0>} : vector<8x8xi32>
    %72 = tpu.iota {dimensions = array<i32: 1>} : vector<8x8xi32>
    %73 = arith.cmpi sgt, %72, %71 : vector<8x8xi32>
    %74 = vector.shape_cast %73 : vector<8x8xi1> to vector<1x8x8xi1>
    %cst_20 = arith.constant -3.40282347E+38 : f32
    %75 = vector.shape_cast %74 : vector<1x8x8xi1> to vector<1x8x8xi1>
    %76 = vector.broadcast %75 : vector<1x8x8xi1> to vector<8x8x8xi1>
    %77 = vector.broadcast %cst_20 : f32 to vector<8x8x8xf32>
    %78 = arith.select %76, %77, %70 : vector<8x8x8xi1>, vector<8x8x8xf32>
    %cst_21 = arith.constant dense<0xFF800000> : vector<8x8xf32>
    %79 = vector.multi_reduction <maximumf>, %78, %cst_21 [2] : vector<8x8x8xf32> to vector<8x8xf32>
    %80 = vector.shape_cast %79 : vector<8x8xf32> to vector<8x8x1xf32>
    %81 = vector.broadcast %80 : vector<8x8x1xf32> to vector<8x8x8xf32>
    %82 = arith.subf %78, %81 : vector<8x8x8xf32>
    %83 = math.exp %82 : vector<8x8x8xf32>
    %cst_22 = arith.constant dense<0.000000e+00> : vector<8x8xf32>
    %84 = vector.multi_reduction <add>, %83, %cst_22 [2] : vector<8x8x8xf32> to vector<8x8xf32>
    %85 = vector.shape_cast %84 : vector<8x8xf32> to vector<8x8x1xf32>
    %86 = tpu.reciprocal %85 {approx = true} : vector<8x8x1xf32> -> vector<8x8x1xf32>
    %87 = vector.broadcast %86 : vector<8x8x1xf32> to vector<8x8x8xf32>
    %88 = arith.mulf %83, %87 : vector<8x8x8xf32>
    %89 = arith.truncf %88 : vector<8x8x8xf32> to vector<8x8x8xbf16>
    %90 = arith.truncf %67 : vector<8x8x16xf32> to vector<8x8x16xbf16>
    "tpu.trace_start"() <{level = 10 : i32, message = "bqk,bkd->bqd"}> : () -> ()
    %cst_23 = arith.constant dense<0.000000e+00> : vector<8x8x16xf32>
    %91 = tpu.matmul %89, %90, %cst_23 {dimension_numbers = #tpu.dot_dimension_numbers<[2], [1], [1], [2], [0, 0, 0, 1, 1, 2], [0], [0]>} : vector<8x8x8xbf16>, vector<8x8x16xbf16>, vector<8x8x16xf32> -> vector<8x8x16xf32>
    "tpu.trace_stop"() : () -> ()
    %92 = vector.shape_cast %91 : vector<8x8x16xf32> to vector<4x2x8x16xf32>
    %93 = vector.extract_strided_slice %92 {offsets = [0, 0, 0, 0], sizes = [1, 2, 8, 16], strides = [1, 1, 1, 1]} : vector<4x2x8x16xf32> to vector<1x2x8x16xf32>
    %94 = vector.shape_cast %93 : vector<1x2x8x16xf32> to vector<2x8x16xf32>
    %95 = vector.extract_strided_slice %92 {offsets = [1, 0, 0, 0], sizes = [1, 2, 8, 16], strides = [1, 1, 1, 1]} : vector<4x2x8x16xf32> to vector<1x2x8x16xf32>
    %96 = vector.shape_cast %95 : vector<1x2x8x16xf32> to vector<2x8x16xf32>
    %97 = vector.extract_strided_slice %92 {offsets = [2, 0, 0, 0], sizes = [1, 2, 8, 16], strides = [1, 1, 1, 1]} : vector<4x2x8x16xf32> to vector<1x2x8x16xf32>
    %98 = vector.shape_cast %97 : vector<1x2x8x16xf32> to vector<2x8x16xf32>
    %99 = vector.extract_strided_slice %92 {offsets = [3, 0, 0, 0], sizes = [1, 2, 8, 16], strides = [1, 1, 1, 1]} : vector<4x2x8x16xf32> to vector<1x2x8x16xf32>
    %100 = vector.shape_cast %99 : vector<1x2x8x16xf32> to vector<2x8x16xf32>
    %101 = tpu.concatenate %94, %96, %98, %100 in 2 : vector<2x8x16xf32>, vector<2x8x16xf32>, vector<2x8x16xf32>, vector<2x8x16xf32> -> vector<2x8x64xf32>
    %102 = vector.shape_cast %101 : vector<2x8x64xf32> to vector<16x64xf32>
    %103 = arith.truncf %102 : vector<16x64xf32> to vector<16x64xbf16>
    %c0_24 = arith.constant 0 : index
    %c0_25 = arith.constant 0 : index
    %104 = vector.load %arg3[%c0_24, %c0_25] : memref<64x32xbf16, #tpu.memory_space<vmem>>, vector<64x32xbf16>
    %cst_26 = arith.constant dense<0.000000e+00> : vector<16x32xf32>
    %105 = tpu.matmul %103, %104, %cst_26 {dimension_numbers = #tpu.dot_dimension_numbers<[1], [0], [0], [1], [0, 0, 1, 1], [], []>} : vector<16x64xbf16>, vector<64x32xbf16>, vector<16x32xf32> -> vector<16x32xf32>
    %106 = arith.negf %30 : vector<16x128xf32>
    %107 = math.exp %106 : vector<16x128xf32>
    %cst_27 = arith.constant 1.000000e+00 : f32
    %108 = vector.broadcast %cst_27 : f32 to vector<16x128xf32>
    %109 = arith.addf %108, %107 : vector<16x128xf32>
    %110 = arith.divf %108, %109 : vector<16x128xf32>
    %111 = arith.mulf %30, %110 : vector<16x128xf32>
    %112 = arith.mulf %111, %29 : vector<16x128xf32>
    %113 = arith.truncf %112 : vector<16x128xf32> to vector<16x128xbf16>
    %c0_28 = arith.constant 0 : index
    %c0_29 = arith.constant 0 : index
    %114 = vector.load %arg4[%c0_28, %c0_29] : memref<128x32xbf16, #tpu.memory_space<vmem>>, vector<128x32xbf16>
    %cst_30 = arith.constant dense<0.000000e+00> : vector<16x32xf32>
    %115 = tpu.matmul %113, %114, %cst_30 {dimension_numbers = #tpu.dot_dimension_numbers<[1], [0], [0], [1], [0, 0, 1, 1], [], []>} : vector<16x128xbf16>, vector<128x32xbf16>, vector<16x32xf32> -> vector<16x32xf32>
    %116 = arith.addf %105, %115 : vector<16x32xf32>
    %117 = vector.shape_cast %116 : vector<16x32xf32> to vector<2x8x32xf32>
    %c0_31 = arith.constant 0 : index
    %c0_32 = arith.constant 0 : index
    %c0_33 = arith.constant 0 : index
    %118 = vector.load %arg9[%c0_31, %c0_32, %c0_33] : memref<2x8x32xf32, #tpu.memory_space<vmem>>, vector<2x8x32xf32>
    tpu.vector_store %arg9[%c0_31, %c0_32, %c0_33], %117 {strides = array<i32>} : memref<2x8x32xf32, #tpu.memory_space<vmem>>, vector<2x8x32xf32>,
    return
  }
}

</mosaic_0001>

<bundles_post_ra>
// kernel: tpu_custom_call.1
= control target key start
LH: loop header
LB: loop body
LE: loop exit
PB: predicated region body
PF: predicated region fallthrough
CT: control target
= control target key end

     0   :  { %vm36_vm0 = vcmask 261120   ;;  %s2255_s0 = inlined_call_operand.vmem [shape: f32[2,8,32], index: 0, kind: input, shape index: {}]   ;;  %s2256_s1 = inlined_call_operand.vmem [shape: f32[1,32], index: 1, kind: input, shape index: {}]   ;;  %s2257_s2 = inlined_call_operand.vmem [shape: bf16[32,352], index: 2, kind: input, shape index: {}]   ;;  %s2258_s3 = inlined_call_operand.vmem [shape: bf16[64,32], index: 3, kind: input, shape index: {}]   ;;  %s2259_s4 = inlined_call_operand.vmem [shape: bf16[128,32], index: 4, kind: input, shape index: {}]   ;;  %s2260_s5 = inlined_call_operand.vmem [shape: f32[8,16], index: 5, kind: input, shape index: {}]   ;;  %s2261_s6 = inlined_call_operand.vmem [shape: f32[8,16], index: 6, kind: input, shape index: {}]   ;;  %s2262_s7 = inlined_call_operand.vmem [shape: f32[8,16], index: 7, kind: input, shape index: {}]   ;;  %s2263_s8 = inlined_call_operand.vmem [shape: f32[8,16], index: 8, kind: input, shape index: {}]   ;;  %s2264_s9 = inlined_call_operand.hbm [shape: f32[2,8,32], index: 9, kind: output, shape index: {}]  }
   0x1   :  { %v34_v0 = vld [vmem:[%s2255_s0] sm:$0xff]  ;;  %v35_v1 = vld [vmem:[%s2255_s0 + $0x8] sm:$0xff] }
   0x2   :  { %v37_v2 = vsel %vm36_vm0, %v34_v0, 0.0  ;;  %v40_v3 = vsel %vm36_vm0, %v35_v1, 0.0 }
   0x3   :  { %38 = vadd.xlane.f32.xlu0 %v37_v2 }
   0x7   :  { %41 = vadd.xlane.f32.xlu0 %v40_v3 }
   0x8   :  { %14 = vsyncpa [#allocation3], 0  ;;  %v1710_v14 = vld [vmem:[%s2257_s2 + $0x4] ss:$12 sps:$4 sm:$0xff]   ;;  %v1712_v15 = vld [vmem:[%s2257_s2] ss:$12 sps:$4 sm:$0xff]  }
   0x9   :  { %v1713_v16 = vld [vmem:[%s2257_s2 + $0x1c] ss:$12 sps:$4 sm:$0xff]   ;;  %117 = vmatprep.subr.bf16.mxu0 %v1710_v14  ;;  %v1806_v17 = vmov 0   ;;  %v1715_v18 = vld [vmem:[%s2257_s2 + $0x18] ss:$12 sps:$4 sm:$0xff]   ;;  %v1807_v19 = vmov 0.0  }
   0xa   :  { %149 = vmatprep.mubr.bf16.mxu0 %v1806_v17  ;;  %118 = vmatpush1.bf16.msra.mxu0 %v1712_v15  ;;  %vm1808_vm1 = vmmov 0   ;;  %v1450_v29 = vld [vmem:[%s2256_s1] ss:$0 sm:$0xff]  ;;  %v1716_v33 = vld [vmem:[%s2257_s2 + $0x8] ss:$12 sps:$4 sm:$0xff]   ;;  %s1809_s1 = smov 72  }
   0xb   :  { %119 = vmatprep.subr.bf16.mxu0 %v1713_v16  ;;  %1555 = vmatprep.subr.bf16.mxu1 %v1807_v19  ;;  %v1717_v35 = vld [vmem:[%s2257_s2 + $0x20] ss:$12 sps:$4 sm:$0xff]   ;;  %s1810_s26 = smov 56   ;;  %s1811_s28 = smov 64   ;;  %vm278_vm2 = vcmask 64512   ;;  %vm351_vm3 = vcmask 130048  }
   0xc   :  { %1557 = vmatprep.mubr.msk.bf16.mxu1 %vm1808_vm1, %v1807_v19  ;;  %v304_v40 = vld [vmem:[%s2262_s7] sm:$0xff]  ;;  %s1812_s30 = smov 112   ;;  %s1813_s10 = smov 96   ;;  %vm824_vm5 = vcmask 1043456   ;;  %vm1203_vm6 = vcmask 392192   ;;  %vm1387_vm7 = vcmask 523264  }
   0xd   :  { %s1815_s11 = smov 120   ;;  %s1816_s12 = smov 8  }
   0xe   :  { %120 = vmatpush1.bf16.msra.mxu0 %v1715_v18 }
   0xf   :  { %1541 = vmatprep.subr.bf16.mxu0 %v1807_v19 }
  0x90   :  { %v39_v4 = vpop.xlane.xlu0 %38 }
  0x91   :  { %v44_v5 = vmul.f32 0.03125, %v39_v4 }
  0x93   :  { %v46_v6 = vsub.f32 %v34_v0, %v44_v5 }
  0x94   :  { %v42_v7 = vpop.xlane.xlu0 %41 }
  0x95   :  { %v45_v8 = vmul.f32 0.03125, %v42_v7  ;;  %v48_v9 = vmul.f32 %v46_v6, %v46_v6  ;;  %v325_v7 = vld [vmem:[%s2263_s8] sm:$0xff]  ;;  %s1814_s8 = smov 80  }
  0x97   :  { %v47_v10 = vsub.f32 %v35_v1, %v45_v8  ;;  %v50_v11 = vsel %vm36_vm0, %v48_v9, 0.0 }
  0x98   :  { %51 = vadd.xlane.f32.xlu1 %v50_v11 }
  0x99   :  { %v49_v12 = vmul.f32 %v47_v10, %v47_v10 }
  0x9b   :  { %v53_v13 = vsel %vm36_vm0, %v49_v12, 0.0 }
  0x9c   :  { %54 = vadd.xlane.f32.xlu1 %v53_v13 }
 0x125   :  { %v52_v20 = vpop.xlane.xlu1 %51 }
 0x126   :  { %v56_v21 = vmul.f32 0.03125, %v52_v20 }
 0x128   :  { %v58_v22 = vadd.f32 1e-05, %v56_v21 }
 0x129   :  { %v55_v23 = vpop.xlane.xlu1 %54 }
 0x12a   :  { %1730 = vrsqrt.f32 %v58_v22  ;;  %v57_v24 = vmul.f32 0.03125, %v55_v23 }
 0x12c   :  { %v59_v25 = vadd.f32 1e-05, %v57_v24 }
 0x12e   :  { %1732 = vrsqrt.f32 %v59_v25 }
 0x134   :  { %v1731_v26 = vpop.eup %1730 }
 0x135   :  { %v62_v27 = vmul.f32 %v1731_v26, %v46_v6 }
 0x137   :  { %v71_v31 = vmul.f32 %v1450_v29, %v62_v27 }
 0x138   :  { %v1733_v28 = vpop.eup %1732 }
 0x139   :  { %v63_v30 = vmul.f32 %v1733_v28, %v47_v10 }
 0x13b   :  { %v72_v32 = vmul.f32 %v1450_v29, %v63_v30 }
 0x13d   :  { %v73_v34 = vpack.c.bf16 %v72_v32, %v71_v31 }
 0x13f   :  { %1457 = vmatmul.mubr.msk.bf16.vlgmr.msra.gmra.mrb[0].mxu0 %vm36_vm0, %v73_v34 }
 0x140   :  { %1542 = vmatpush3.bf16.msra.mxu0 %v1716_v33  ;;  %1545 = vmatprep.mubr.msk.bf16.mxu0 %vm1808_vm1, %v1807_v19 }
 0x141   :  { %1543 = vmatprep.subr.bf16.mxu0 %v1807_v19 }
 0x144   :  { %1544 = vmatpush3.bf16.msra.mxu0 %v1717_v35  ;;  %v1994_v35 = vld [vmem:[%s2260_s5] sm:$0xff]  ;;  %s1817_s5 = smov 48  }
 0x145   :  { %1549 = vmatprep.subr.bf16.mxu0 %v1807_v19 }
 0x147   :  { %1546 = vmatmul.mubr.msk.bf16.vlgmr.msra.gmra.mrb[4].mxu0 %vm36_vm0, %v73_v34 }
 0x148   :  { %1551 = vmatprep.mubr.msk.bf16.mxu0 %vm1808_vm1, %v1807_v19 }
 0x212   :  { %v1915_v36 = vpop.f32.mrb[0].mxu0 }
 0x213   :  { %317 = vrot.lane.b32.xlu1 %v1915_v36, %s1809_s1  ;;  %311 = vrot.lane.b32.xlu0 %v1915_v36, %s1810_s26  ;;  %v153_v37 = vpop.f32.mrb[1].mxu0 }
 0x214   :  { %v1475_v38 = vmul.f32 -1.442695, %v153_v37  ;;  %v1919_v39 = vpop.f32.mrb[2].mxu0 }
 0x215   :  { %v157_v41 = vpop.f32.mrb[3].mxu0 }
 0x216   :  { %1734 = vpow2.f32 %v1475_v38  ;;  %v1477_v42 = vmul.f32 -1.442695, %v157_v41 }
 0x217   :  { %306 = vrot.lane.b32.xlu0 %v304_v40, %s1811_s28  ;;  %313 = vrot.lane.b32.xlu1 %v1919_v39, %s1810_s26 }
 0x218   :  { %1736 = vpow2.f32 %v1477_v42  ;;  %v222_v42 = vmul.f32 %v1994_v35, %v1915_v36 }
 0x21a   :  { %v194_v43 = vpop.f32.mrb[4].mxu0 }
 0x21b   :  { %v1476_v44 = vmul.f32 -1.442695, %v194_v43  ;;  %319 = vrot.lane.b32.xlu1 %v1919_v39, %s1809_s1  ;;  %v1547_v45 = vpop.f32.mrb[5].mxu0 }
 0x21c   :  { %v197_v46 = vpop.f32.mrb[6].mxu0 }
 0x21d   :  { %1738 = vpow2.f32 %v1476_v44  ;;  %v1478_v47 = vmul.f32 -1.442695, %v197_v46  ;;  %v1548_v48 = vpop.f32.mrb[7].mxu0 }
 0x21f   :  { %1740 = vpow2.f32 %v1478_v47 }
 0x220   :  { %v1735_v49 = vpop.eup %1734 }
 0x221   :  { %v1227_v50 = vadd.f32 1.0, %v1735_v49 }
 0x222   :  { %v1737_v51 = vpop.eup %1736 }
 0x223   :  { %1742 = vrcp.f32 %v1227_v50  ;;  %v1229_v52 = vadd.f32 1.0, %v1737_v51 }
 0x225   :  { %1744 = vrcp.f32 %v1229_v52 }
 0x227   :  { %v1739_v53 = vpop.eup %1738 }
 0x228   :  { %v1228_v54 = vadd.f32 1.0, %v1739_v53 }
 0x229   :  { %v1741_v55 = vpop.eup %1740 }
 0x22a   :  { %1746 = vrcp.f32 %v1228_v54  ;;  %v1230_v56 = vadd.f32 1.0, %v1741_v55  ;;  %v223_v55 = vmul.f32 %v1994_v35, %v1919_v39 }
 0x22c   :  { %1748 = vrcp.f32 %v1230_v56 }
 0x22d   :  { %v1743_v57 = vpop.eup %1742 }
 0x22e   :  { %v1239_v58 = vmul.f32 %v1743_v57, %v153_v37 }
 0x22f   :  { %v1745_v59 = vpop.eup %1744 }
 0x230   :  { %v1928_v60 = vmul.f32 %v1239_v58, %v1915_v36  ;;  %v1241_v61 = vmul.f32 %v1745_v59, %v157_v41 }
 0x232   :  { %v1931_v62 = vmul.f32 %v1241_v61, %v1919_v39 }
 0x234   :  { %v1747_v63 = vpop.eup %1746  ;;  %v1247_v0 = vpack.c.bf16 %v1931_v62, %v1928_v60 }
 0x235   :  { %v1240_v1 = vmul.f32 %v1747_v63, %v194_v43 }
 0x236   :  { %v1749_v2 = vpop.eup %1748 }
 0x237   :  { %v1935_v3 = vmul.f32 %v1240_v1, %v153_v37  ;;  %v1242_v4 = vmul.f32 %v1749_v2, %v197_v46  ;;  %v1999_v37 = vld [vmem:[%s2261_s6] sm:$0xff]  ;;  %s1818_s6 = smov 32  }
 0x239   :  { %v1937_v5 = vmul.f32 %v1242_v4, %v157_v41 }
 0x23b   :  { %v1248_v6 = vpack.c.bf16 %v1937_v5, %v1935_v3 }
 0x285   :  { %v318_v8 = vpop.permute.xlu1 %317  ;;  %v312_v9 = vpop.permute.xlu0 %311 }
 0x286   :  { %v323_v10 = vsel %vm278_vm2, %v312_v9, %v318_v8 }
 0x287   :  { %v326_v11 = vmul.f32 %v325_v7, %v323_v10 }
 0x289   :  { %330 = vrot.lane.b32.xlu1 %v326_v11, %s1811_s28  ;;  %v314_v12 = vpop.permute.xlu1 %313  ;;  %v307_v16 = vpop.permute.xlu0 %306 }
 0x28a   :  { %v309_v17 = vmul.f32 %v307_v16, %v1915_v36  ;;  %v310_v22 = vmul.f32 %v307_v16, %v1919_v39 }
 0x28d   :  { %203 = vrot.lane.b32.xlu1 %v1915_v36, %s1812_s30  ;;  %v320_v13 = vpop.permute.xlu1 %319 }
 0x28e   :  { %v324_v14 = vsel %vm278_vm2, %v314_v12, %v320_v13 }
 0x28f   :  { %v327_v15 = vmul.f32 %v325_v7, %v324_v14 }
 0x291   :  { %209 = vrot.lane.b32.xlu1 %v1915_v36, %s1813_s10  ;;  %332 = vrot.lane.b32.xlu0 %v327_v15, %s1811_s28 }
 0x295   :  { %215 = vrot.lane.b32.xlu1 %v1915_v36, %s1814_s8  ;;  %205 = vrot.lane.b32.xlu0 %v1919_v39, %s1812_s30 }
 0x299   :  { %230 = vrot.lane.b32.xlu1 %v1915_v36, %s1815_s11  ;;  %211 = vrot.lane.b32.xlu0 %v1919_v39, %s1813_s10 }
 0x29d   :  { %217 = vrot.lane.b32.xlu0 %v1919_v39, %s1814_s8 }
 0x2a1   :  { %232 = vrot.lane.b32.xlu0 %v1919_v39, %s1815_s11 }
 0x2fb   :  { %v331_v18 = vpop.permute.xlu1 %330 }
 0x2fc   :  { %v336_v20 = vadd.f32 %v331_v18, %v309_v17 }
 0x2fe   :  { %v346_v21 = vpack.c.bf16 %v336_v20, %v336_v20 }
 0x2ff   :  { %v204_v26 = vpop.permute.xlu1 %203 }
 0x300   :  { %349 = vrot.lane.b32.xlu1 %v346_v21, %s1811_s28  ;;  %v224_v53 = vmul.f32 %v1994_v35, %v204_v26 }
 0x303   :  { %v333_v23 = vpop.permute.xlu0 %332  ;;  %v210_v27 = vpop.permute.xlu1 %209 }
 0x304   :  { %v337_v24 = vadd.f32 %v333_v23, %v310_v22  ;;  %254 = vrot.lane.b32.xlu1 %v1915_v36, %s1816_s12  ;;  %v226_v7 = vmul.f32 %v1994_v35, %v210_v27 }
 0x306   :  { %v347_v25 = vpack.c.bf16 %v337_v24, %v337_v24 }
 0x307   :  { %v206_v28 = vpop.permute.xlu0 %205  ;;  %v1972_v29 = vpop.permute.xlu1 %215 }
 0x308   :  { %234 = vrot.lane.b32.xlu1 %v204_v26, %s1815_s11  ;;  %399 = vrot.lane.b32.xlu0 %v347_v25, %s1811_s28  ;;  %v225_v10 = vmul.f32 %v1994_v35, %v206_v28  ;;  %v228_v22 = vmul.f32 %v1994_v35, %v1972_v29 }
 0x30b   :  { %v1974_v30 = vpop.permute.xlu0 %211  ;;  %v231_v32 = vpop.permute.xlu1 %230 }
 0x30c   :  { %258 = vrot.lane.b32.xlu1 %v204_v26, %s1816_s12  ;;  %256 = vrot.lane.b32.xlu0 %v1919_v39, %s1816_s12  ;;  %v227_v25 = vmul.f32 %v1994_v35, %v1974_v30 }
 0x30f   :  { %v1984_v31 = vpop.permute.xlu0 %217 }
 0x310   :  { %238 = vrot.lane.b32.xlu1 %v210_v27, %s1815_s11  ;;  %236 = vrot.lane.b32.xlu0 %v206_v28, %s1815_s11 }
 0x313   :  { %v233_v38 = vpop.permute.xlu0 %232 }
 0x314   :  { %262 = vrot.lane.b32.xlu1 %v210_v27, %s1816_s12  ;;  %260 = vrot.lane.b32.xlu0 %v206_v28, %s1816_s12 }
 0x318   :  { %242 = vrot.lane.b32.xlu1 %v1972_v29, %s1815_s11  ;;  %240 = vrot.lane.b32.xlu0 %v1974_v30, %s1815_s11 }
 0x31c   :  { %266 = vrot.lane.b32.xlu1 %v1972_v29, %s1816_s12  ;;  %264 = vrot.lane.b32.xlu0 %v1974_v30, %s1816_s12 }
 0x320   :  { %244 = vrot.lane.b32.xlu0 %v1984_v31, %s1815_s11  ;;  %s1819_s11 = smov 16  }
 0x324   :  { %268 = vrot.lane.b32.xlu0 %v1984_v31, %s1816_s12 }
 0x372   :  { %v350_v33 = vpop.permute.xlu1 %349 }
 0x373   :  { %v356_v34 = vsel %vm351_vm3, %v350_v33, 0 }
 0x374   :  { %1550 = vmatpush3.bf16.xpose.msra.mxu0 %v356_v34 }
 0x375   :  { %1561 = vmatprep.subr.bf16.mxu0 %v1807_v19 }
 0x376   :  { %v255_v40 = vpop.permute.xlu1 %254 }
 0x377   :  { %v279_v41 = vsel %vm278_vm2, %v231_v32, %v255_v40  ;;  %v229_v40 = vmul.f32 %v1994_v35, %v1984_v31 }
 0x378   :  { %v288_v43 = vmul.f32 %v1999_v37, %v279_v41 }
 0x37a   :  { %v296_v44 = vadd.f32 %v288_v43, %v222_v42  ;;  %v235_v45 = vpop.permute.xlu1 %234  ;;  %v400_v46 = vpop.permute.xlu0 %399 }
 0x37b   :  { %v2007_v47 = vsel %vm351_vm3, %v400_v46, 0 }
 0x37c   :  { %v338_v48 = vpack.c.bf16 %v296_v44, %v296_v44  ;;  %1556 = vmatpush3.bf16.xpose.msra.mxu1 %v2007_v47  ;;  %v705_v44 = vlaneseq }
 0x37d   :  { %1567 = vmatprep.subr.bf16.mxu1 %v1807_v19 }
 0x37e   :  { %1552 = vmatmul.mubr.msk.bf16.vlgmr.msra.gmra.mrb[8].mxu0 %vm351_vm3, %v338_v48  ;;  %v259_v49 = vpop.permute.xlu1 %258  ;;  %v257_v50 = vpop.permute.xlu0 %256  ;;  %v708_v46 = vand.u32 127, %v705_v44 }
 0x37f   :  { %1562 = vmatpush3.bf16.xpose.msra.mxu0 %v356_v34  ;;  %v281_v51 = vsel %vm278_vm2, %v235_v45, %v259_v49  ;;  %v280_v52 = vsel %vm278_vm2, %v233_v38, %v257_v50  ;;  %1563 = vmatprep.mubr.msk.bf16.mxu0 %vm1808_vm1, %v1807_v19  ;;  %v706_v45 = vshrl.u32 %v705_v44, 7 }
 0x380   :  { %v290_v54 = vmul.f32 %v1999_v37, %v281_v51  ;;  %v289_v56 = vmul.f32 %v1999_v37, %v280_v52  ;;  %1573 = vmatprep.subr.bf16.mxu0 %v1807_v19 }
 0x381   :  { %vm2069_vm4 = vcmp.gt.s32.totalorder %v708_v46, %v706_v45 }
 0x382   :  { %v298_v57 = vadd.f32 %v290_v54, %v224_v53  ;;  %v297_v58 = vadd.f32 %v289_v56, %v223_v55  ;;  %v239_v59 = vpop.permute.xlu1 %238  ;;  %v237_v61 = vpop.permute.xlu0 %236 }
 0x384   :  { %v340_v63 = vpack.c.bf16 %v298_v57, %v298_v57  ;;  %v339_v1 = vpack.c.bf16 %v297_v58, %v297_v58 }
 0x386   :  { %1564 = vmatmul.mubr.msk.bf16.vlgmr.msra.gmra.mrb[12].mxu0 %vm351_vm3, %v340_v63  ;;  %v263_v2 = vpop.permute.xlu1 %262  ;;  %v261_v4 = vpop.permute.xlu0 %260  ;;  %1558 = vmatmul.mubr.msk.bf16.vlgmr.msra.gmra.mrb[0].mxu1 %vm351_vm3, %v339_v1 }
 0x387   :  { %1574 = vmatpush3.bf16.xpose.msra.mxu0 %v356_v34  ;;  %v283_v8 = vsel %vm278_vm2, %v239_v59, %v263_v2  ;;  %v282_v9 = vsel %vm278_vm2, %v237_v61, %v261_v4  ;;  %1568 = vmatpush3.bf16.xpose.msra.mxu1 %v2007_v47 }
 0x388   :  { %v292_v11 = vmul.f32 %v1999_v37, %v283_v8  ;;  %v291_v12 = vmul.f32 %v1999_v37, %v282_v9  ;;  %1569 = vmatprep.mubr.msk.bf16.mxu1 %vm1808_vm1, %v1807_v19  ;;  %1575 = vmatprep.mubr.msk.bf16.mxu0 %vm1808_vm1, %v1807_v19 }
 0x389   :  { %1579 = vmatprep.subr.bf16.mxu1 %v1807_v19  ;;  %1585 = vmatprep.subr.bf16.mxu0 %v1807_v19 }
 0x38a   :  { %v300_v13 = vadd.f32 %v292_v11, %v226_v7  ;;  %v299_v14 = vadd.f32 %v291_v12, %v225_v10  ;;  %v243_v15 = vpop.permute.xlu1 %242  ;;  %v241_v16 = vpop.permute.xlu0 %240 }
 0x38c   :  { %v342_v17 = vpack.c.bf16 %v300_v13, %v300_v13  ;;  %v341_v18 = vpack.c.bf16 %v299_v14, %v299_v14 }
 0x38e   :  { %1576 = vmatmul.mubr.msk.bf16.vlgmr.msra.gmra.mrb[16].mxu0 %vm351_vm3, %v342_v17  ;;  %v267_v20 = vpop.permute.xlu1 %266  ;;  %v265_v21 = vpop.permute.xlu0 %264  ;;  %1570 = vmatmul.mubr.msk.bf16.vlgmr.msra.gmra.mrb[4].mxu1 %vm351_vm3, %v341_v18 }
 0x38f   :  { %1586 = vmatpush3.bf16.xpose.msra.mxu0 %v356_v34  ;;  %v285_v23 = vsel %vm278_vm2, %v243_v15, %v267_v20  ;;  %v284_v24 = vsel %vm278_vm2, %v241_v16, %v265_v21  ;;  %1580 = vmatpush3.bf16.xpose.msra.mxu1 %v2007_v47 }
 0x390   :  { %v294_v26 = vmul.f32 %v1999_v37, %v285_v23  ;;  %v293_v27 = vmul.f32 %v1999_v37, %v284_v24  ;;  %1581 = vmatprep.mubr.msk.bf16.mxu1 %vm1808_vm1, %v1807_v19  ;;  %1587 = vmatprep.mubr.msk.bf16.mxu0 %vm1808_vm1, %v1807_v19 }
 0x391   :  { %1591 = vmatprep.subr.bf16.mxu1 %v1807_v19  ;;  %1597 = vmatprep.subr.bf16.mxu0 %v1807_v19 }
 0x392   :  { %v302_v28 = vadd.f32 %v294_v26, %v228_v22  ;;  %v301_v29 = vadd.f32 %v293_v27, %v227_v25  ;;  %v245_v32 = vpop.permute.xlu0 %244 }
 0x394   :  { %v344_v33 = vpack.c.bf16 %v302_v28, %v302_v28  ;;  %v343_v34 = vpack.c.bf16 %v301_v29, %v301_v29 }
 0x396   :  { %1588 = vmatmul.mubr.msk.bf16.vlgmr.msra.gmra.mrb[20].mxu0 %vm351_vm3, %v344_v33  ;;  %v269_v30 = vpop.permute.xlu0 %268  ;;  %1582 = vmatmul.mubr.msk.bf16.vlgmr.msra.gmra.mrb[8].mxu1 %vm351_vm3, %v343_v34 }
 0x397   :  { %v286_v38 = vsel %vm278_vm2, %v245_v32, %v269_v30  ;;  %1592 = vmatpush3.bf16.xpose.msra.mxu1 %v2007_v47  ;;  %1593 = vmatprep.mubr.msk.bf16.mxu1 %vm1808_vm1, %v1807_v19 }
 0x398   :  { %v295_v41 = vmul.f32 %v1999_v37, %v286_v38  ;;  %1599 = vmatprep.mubr.msk.bf16.mxu0 %vm1808_vm1, %v1807_v19  ;;  %1603 = vmatprep.subr.bf16.mxu1 %v1807_v19 }
 0x39a   :  { %v303_v42 = vadd.f32 %v295_v41, %v229_v40 }
 0x39c   :  { %v345_v43 = vpack.c.bf16 %v303_v42, %v303_v42 }
 0x39e   :  { %1594 = vmatmul.mubr.msk.bf16.vlgmr.msra.gmra.mrb[12].mxu1 %vm351_vm3, %v345_v43 }
 0x39f   :  { %1605 = vmatprep.mubr.msk.bf16.mxu1 %vm1808_vm1, %v1807_v19 }
 0x451   :  { %v392_v31 = vpop.f32.mrb[8].mxu0 }
 0x452   :  { %v712_v35 = vsel %vm2069_vm4, -3.4028235e+38, %v392_v31  ;;  %v1553_v37 = vpop.f32.mrb[9].mxu0 }
 0x453   :  { %v395_v48 = vpop.f32.mrb[10].mxu0  ;;  %v720_v49 = vsel %vm278_vm2, %v712_v35, -inf }
 0x454   :  { %721 = vmax.xlane.f32.xlu1 %v720_v49  ;;  %v1554_v50 = vpop.f32.mrb[11].mxu0 }
 0x459   :  { %v441_v51 = vpop.f32.mrb[0].mxu1  ;;  %v484_v52 = vpop.f32.mrb[12].mxu0 }
 0x45a   :  { %v713_v53 = vsel %vm2069_vm4, -3.4028235e+38, %v441_v51  ;;  %v1559_v54 = vpop.f32.mrb[1].mxu1  ;;  %v1565_v55 = vpop.f32.mrb[13].mxu0  ;;  %v714_v59 = vsel %vm2069_vm4, -3.4028235e+38, %v484_v52 }
 0x45b   :  { %v444_v56 = vpop.f32.mrb[2].mxu1  ;;  %v487_v57 = vpop.f32.mrb[14].mxu0  ;;  %v723_v58 = vsel %vm278_vm2, %v713_v53, -inf  ;;  %v726_v1 = vsel %vm278_vm2, %v714_v59, -inf }
 0x45c   :  { %724 = vmax.xlane.f32.xlu0 %v723_v58  ;;  %v1560_v61 = vpop.f32.mrb[3].mxu1  ;;  %v1566_v63 = vpop.f32.mrb[15].mxu0 }
 0x460   :  { %727 = vmax.xlane.f32.xlu0 %v726_v1 }
 0x461   :  { %v527_v2 = vpop.f32.mrb[4].mxu1  ;;  %v570_v4 = vpop.f32.mrb[16].mxu0 }
 0x462   :  { %v715_v7 = vsel %vm2069_vm4, -3.4028235e+38, %v527_v2  ;;  %v716_v8 = vsel %vm2069_vm4, -3.4028235e+38, %v570_v4  ;;  %v1571_v9 = vpop.f32.mrb[5].mxu1  ;;  %v1577_v10 = vpop.f32.mrb[17].mxu0 }
 0x463   :  { %v530_v11 = vpop.f32.mrb[6].mxu1  ;;  %v573_v12 = vpop.f32.mrb[18].mxu0  ;;  %v729_v13 = vsel %vm278_vm2, %v715_v7, -inf  ;;  %v732_v14 = vsel %vm278_vm2, %v716_v8, -inf }
 0x464   :  { %v1572_v15 = vpop.f32.mrb[7].mxu1  ;;  %730 = vmax.xlane.f32.xlu0 %v729_v13  ;;  %733 = vmax.xlane.f32.xlu1 %v732_v14  ;;  %v1578_v16 = vpop.f32.mrb[19].mxu0 }
 0x469   :  { %v613_v17 = vpop.f32.mrb[8].mxu1  ;;  %v656_v18 = vpop.f32.mrb[20].mxu0 }
 0x46a   :  { %v717_v20 = vsel %vm2069_vm4, -3.4028235e+38, %v613_v17  ;;  %v718_v21 = vsel %vm2069_vm4, -3.4028235e+38, %v656_v18  ;;  %v1583_v22 = vpop.f32.mrb[9].mxu1  ;;  %v1589_v23 = vpop.f32.mrb[21].mxu0 }
 0x46b   :  { %v616_v24 = vpop.f32.mrb[10].mxu1  ;;  %v659_v25 = vpop.f32.mrb[22].mxu0  ;;  %v735_v26 = vsel %vm278_vm2, %v717_v20, -inf  ;;  %v738_v27 = vsel %vm278_vm2, %v718_v21, -inf  ;;  %v817_v22 = vpack.c.bf16 %v1919_v39, %v1919_v39 }
 0x46c   :  { %v1584_v28 = vpop.f32.mrb[11].mxu1  ;;  %736 = vmax.xlane.f32.xlu0 %v735_v26  ;;  %739 = vmax.xlane.f32.xlu1 %v738_v27  ;;  %v1590_v29 = vpop.f32.mrb[23].mxu0 }
 0x471   :  { %v699_v32 = vpop.f32.mrb[12].mxu1 }
 0x472   :  { %v719_v33 = vsel %vm2069_vm4, -3.4028235e+38, %v699_v32  ;;  %v1595_v34 = vpop.f32.mrb[13].mxu1 }
 0x473   :  { %v702_v30 = vpop.f32.mrb[14].mxu1  ;;  %v741_v38 = vsel %vm278_vm2, %v719_v33, -inf }
 0x474   :  { %v1596_v40 = vpop.f32.mrb[15].mxu1  ;;  %742 = vmax.xlane.f32.xlu0 %v741_v38 }
 0x4e1   :  { %v722_v41 = vpop.xlane.xlu1 %721 }
 0x4e2   :  { %v744_v42 = vsub.f32 %v712_v35, %v722_v41 }
 0x4e4   :  { %v752_v43 = vmul.f32 1.442695, %v744_v42 }
 0x4e6   :  { %1750 = vpow2.f32 %v752_v43 }
 0x4e9   :  { %v725_v44 = vpop.xlane.xlu0 %724 }
 0x4ea   :  { %v745_v45 = vsub.f32 %v713_v53, %v725_v44 }
 0x4ec   :  { %v754_v46 = vmul.f32 1.442695, %v745_v45 }
 0x4ed   :  { %v728_v31 = vpop.xlane.xlu0 %727 }
 0x4ee   :  { %1752 = vpow2.f32 %v754_v46  ;;  %v746_v37 = vsub.f32 %v714_v59, %v728_v31 }
 0x4f0   :  { %v2097_v48 = vpop.eup %1750  ;;  %v756_v47 = vmul.f32 1.442695, %v746_v37 }
 0x4f1   :  { %v731_v49 = vpop.xlane.xlu0 %730  ;;  %v734_v50 = vpop.xlane.xlu1 %733  ;;  %v768_v51 = vsel %vm278_vm2, %v2097_v48, 0.0 }
 0x4f2   :  { %1754 = vpow2.f32 %v756_v47  ;;  %v747_v52 = vsub.f32 %v715_v7, %v731_v49  ;;  %v748_v54 = vsub.f32 %v716_v8, %v734_v50  ;;  %769 = vadd.xlane.f32.xlu1 %v768_v51 }
 0x4f4   :  { %v758_v35 = vmul.f32 1.442695, %v747_v52  ;;  %v760_v55 = vmul.f32 1.442695, %v748_v54 }
 0x4f6   :  { %1756 = vpow2.f32 %v758_v35 }
 0x4f7   :  { %1758 = vpow2.f32 %v760_v55 }
 0x4f8   :  { %v2101_v53 = vpop.eup %1752 }
 0x4f9   :  { %v737_v56 = vpop.xlane.xlu0 %736  ;;  %v740_v57 = vpop.xlane.xlu1 %739  ;;  %v771_v58 = vsel %vm278_vm2, %v2101_v53, 0.0 }
 0x4fa   :  { %v749_v59 = vsub.f32 %v717_v20, %v737_v56  ;;  %v750_v61 = vsub.f32 %v718_v21, %v740_v57  ;;  %772 = vadd.xlane.f32.xlu0 %v771_v58  ;;  %v816_v21 = vpack.c.bf16 %v1915_v36, %v1915_v36  ;;  %v1718_v56 = vld [vmem:[%s2259_s4] sm:$0xff]   ;;  %v1719_v57 = vld [vmem:[%s2259_s4 + $0x8] sm:$0xff]   ;;  %v1720_v58 = vld [vmem:[%s2259_s4 + $0x10] sm:$0xff]  }
 0x4fc   :  { %v1755_v63 = vpop.eup %1754  ;;  %v762_v1 = vmul.f32 1.442695, %v749_v59  ;;  %v764_v2 = vmul.f32 1.442695, %v750_v61 }
 0x4fd   :  { %v774_v4 = vsel %vm278_vm2, %v1755_v63, 0.0 }
 0x4fe   :  { %1760 = vpow2.f32 %v762_v1  ;;  %775 = vadd.xlane.f32.xlu1 %v774_v4  ;;  %v1721_v4 = vld [vmem:[%s2259_s4 + $0x18] sm:$0xff]  }
 0x4ff   :  { %1762 = vpow2.f32 %v764_v2 }
 0x500   :  { %v2106_v7 = vpop.eup %1756 }
 0x501   :  { %v2108_v8 = vpop.eup %1758  ;;  %v743_v9 = vpop.xlane.xlu0 %742  ;;  %v777_v10 = vsel %vm278_vm2, %v2106_v7, 0.0 }
 0x502   :  { %v751_v11 = vsub.f32 %v719_v33, %v743_v9  ;;  %778 = vadd.xlane.f32.xlu0 %v777_v10  ;;  %v780_v12 = vsel %vm278_vm2, %v2108_v8, 0.0 }
 0x503   :  { %781 = vadd.xlane.f32.xlu1 %v780_v12  ;;  %v1722_v12 = vld [vmem:[%s2259_s4 + $0x20] sm:$0xff]  }
 0x504   :  { %v766_v13 = vmul.f32 1.442695, %v751_v11 }
 0x506   :  { %1764 = vpow2.f32 %v766_v13 }
 0x508   :  { %v2114_v14 = vpop.eup %1760 }
 0x509   :  { %v2116_v15 = vpop.eup %1762  ;;  %v783_v16 = vsel %vm278_vm2, %v2114_v14, 0.0 }
 0x50a   :  { %784 = vadd.xlane.f32.xlu0 %v783_v16  ;;  %v786_v17 = vsel %vm278_vm2, %v2116_v15, 0.0 }
 0x50b   :  { %787 = vadd.xlane.f32.xlu1 %v786_v17  ;;  %v1724_v17 = vld [vmem:[%s2259_s4 + $0x28] sm:$0xff]  }
 0x510   :  { %v2122_v18 = vpop.eup %1764 }
 0x511   :  { %v789_v20 = vsel %vm278_vm2, %v2122_v18, 0.0 }
 0x512   :  { %790 = vadd.xlane.f32.xlu0 %v789_v20 }
 0x51c   :  { %819 = vrot.lane.b32.xlu1 %v816_v21, %s1817_s5 }
 0x528   :  { %869 = vrot.lane.b32.xlu0 %v817_v22, %s1817_s5 }
 0x52c   :  { %1267 = vrot.lane.b32.xlu0 %v1247_v0, %s1818_s6 }
 0x57f   :  { %v770_v23 = vpop.xlane.xlu1 %769 }
 0x580   :  { %1766 = vrcp.f32 %v770_v23 }
 0x587   :  { %v773_v25 = vpop.xlane.xlu0 %772 }
 0x588   :  { %1768 = vrcp.f32 %v773_v25  ;;  %v1726_v25 = vld [vmem:[%s2259_s4 + $0x30] sm:$0xff]  }
 0x58a   :  { %v1767_v27 = vpop.eup %1766 }
 0x58b   :  { %v776_v24 = vpop.xlane.xlu1 %775  ;;  %v800_v39 = vmul.f32 %v1767_v27, %v2097_v48 }
 0x58c   :  { %1770 = vrcp.f32 %v776_v24 }
 0x58d   :  { %v808_v0 = vpack.c.bf16 %v800_v39, %v800_v39 }
 0x58f   :  { %v779_v36 = vpop.xlane.xlu0 %778 }
 0x590   :  { %v782_v26 = vpop.xlane.xlu1 %781  ;;  %1772 = vrcp.f32 %v779_v36 }
 0x591   :  { %1774 = vrcp.f32 %v782_v26  ;;  %v1727_v26 = vld [vmem:[%s2258_s3 + $0x10] sm:$0xff]  }
 0x592   :  { %v1769_v60 = vpop.eup %1768 }
 0x593   :  { %v801_v30 = vmul.f32 %v1769_v60, %v2101_v53 }
 0x595   :  { %v809_v42 = vpack.c.bf16 %v801_v30, %v801_v30 }
 0x596   :  { %v1771_v34 = vpop.eup %1770 }
 0x597   :  { %v785_v29 = vpop.xlane.xlu0 %784  ;;  %v802_v38 = vmul.f32 %v1771_v34, %v1755_v63 }
 0x598   :  { %v788_v28 = vpop.xlane.xlu1 %787  ;;  %1776 = vrcp.f32 %v785_v29  ;;  %v1728_v29 = vld [vmem:[%s2259_s4 + $0x38] sm:$0xff]  }
 0x599   :  { %1778 = vrcp.f32 %v788_v28  ;;  %v810_v44 = vpack.c.bf16 %v802_v38, %v802_v38 }
 0x59a   :  { %v1773_v43 = vpop.eup %1772 }
 0x59b   :  { %v1775_v45 = vpop.eup %1774  ;;  %v803_v46 = vmul.f32 %v1773_v43, %v2106_v7  ;;  %v1723_v7 = vld [vmem:[%s2258_s3] sm:$0xff]  }
 0x59c   :  { %v820_v32 = vpop.permute.xlu1 %819  ;;  %v804_v31 = vmul.f32 %v1775_v45, %v2108_v8 }
 0x59d   :  { %v826_v33 = vsel %vm824_vm5, %v820_v32, 0  ;;  %v811_v37 = vpack.c.bf16 %v803_v46, %v803_v46  ;;  %v1729_v32 = vld [vmem:[%s2258_s3 + $0x18] sm:$0xff]  }
 0x59e   :  { %1598 = vmatpush3.bf16.msra.mxu0 %v826_v33  ;;  %v812_v47 = vpack.c.bf16 %v804_v31, %v804_v31 }
 0x59f   :  { %v791_v62 = vpop.xlane.xlu0 %790  ;;  %1609 = vmatprep.subr.bf16.mxu0 %v1807_v19 }
 0x5a0   :  { %1780 = vrcp.f32 %v791_v62 }
 0x5a1   :  { %1600 = vmatmul.mubr.msk.bf16.vlgmr.msra.gmra.mrb[24].mxu0 %vm278_vm2, %v808_v0 }
 0x5a2   :  { %1610 = vmatpush3.bf16.msra.mxu0 %v826_v33  ;;  %1611 = vmatprep.mubr.msk.bf16.mxu0 %vm1808_vm1, %v1807_v19  ;;  %v1777_v48 = vpop.eup %1776 }
 0x5a3   :  { %v870_v40 = vpop.permute.xlu0 %869  ;;  %1621 = vmatprep.subr.bf16.mxu0 %v1807_v19  ;;  %v1779_v49 = vpop.eup %1778  ;;  %v805_v50 = vmul.f32 %v1777_v48, %v2114_v14 }
 0x5a4   :  { %v875_v41 = vsel %vm824_vm5, %v870_v40, 0  ;;  %v806_v51 = vmul.f32 %v1779_v49, %v2116_v15 }
 0x5a5   :  { %1604 = vmatpush3.bf16.msra.mxu1 %v875_v41  ;;  %v813_v52 = vpack.c.bf16 %v805_v50, %v805_v50 }
 0x5a6   :  { %1615 = vmatprep.subr.bf16.mxu1 %v1807_v19  ;;  %v814_v35 = vpack.c.bf16 %v806_v51, %v806_v51 }
 0x5a8   :  { %1606 = vmatmul.mubr.msk.bf16.vlgmr.msra.gmra.mrb[16].mxu1 %vm278_vm2, %v809_v42 }
 0x5a9   :  { %1612 = vmatmul.mubr.msk.bf16.vlgmr.msra.gmra.mrb[28].mxu0 %vm278_vm2, %v810_v44  ;;  %1616 = vmatpush3.bf16.msra.mxu1 %v875_v41 }
 0x5aa   :  { %1622 = vmatpush3.bf16.msra.mxu0 %v826_v33  ;;  %1617 = vmatprep.mubr.msk.bf16.mxu1 %vm1808_vm1, %v1807_v19  ;;  %v1781_v54 = vpop.eup %1780 }
 0x5ab   :  { %1623 = vmatprep.mubr.msk.bf16.mxu0 %vm1808_vm1, %v1807_v19  ;;  %1627 = vmatprep.subr.bf16.mxu1 %v1807_v19  ;;  %v807_v55 = vmul.f32 %v1781_v54, %v2122_v18  ;;  %v1725_v18 = vld [vmem:[%s2258_s3 + $0x8] sm:$0xff]   ;;  %s1820_s3 = smov [#allocation2]  }
 0x5ac   :  { %1633 = vmatprep.subr.bf16.mxu0 %v1807_v19  ;;  %s1439_s4 = sshll.u32 %s1820_s3, 4  ;;  %s1440_s4 = int_to_ptr.vmem [resolvable:$true] %s1439_s4 }
 0x5ad   :  { %v815_v53 = vpack.c.bf16 %v807_v55, %v807_v55  ;;  %v1268_v55 = vpop.permute.xlu0 %1267  ;;  %p1787_p1 = scmp.lt.s32.totalorder %s1440_s4, %s1440_s4 }
 0x5b0   :  { %1618 = vmatmul.mubr.msk.bf16.vlgmr.msra.gmra.mrb[20].mxu1 %vm278_vm2, %v811_v37 }
 0x5b1   :  { %1624 = vmatmul.mubr.msk.bf16.vlgmr.msra.gmra.mrb[32].mxu0 %vm278_vm2, %v812_v47  ;;  %1628 = vmatpush3.bf16.msra.mxu1 %v875_v41 }
 0x5b2   :  { %1634 = vmatpush3.bf16.msra.mxu0 %v826_v33  ;;  %1629 = vmatprep.mubr.msk.bf16.mxu1 %vm1808_vm1, %v1807_v19 }
 0x5b3   :  { %1635 = vmatprep.mubr.msk.bf16.mxu0 %vm1808_vm1, %v1807_v19  ;;  %1639 = vmatprep.subr.bf16.mxu1 %v1807_v19 }
 0x5b4   :  { %1665 = vmatprep.subr.bf16.mxu0 %v1807_v19 }
 0x5b8   :  { %1630 = vmatmul.mubr.msk.bf16.vlgmr.msra.gmra.mrb[24].mxu1 %vm278_vm2, %v813_v52 }
 0x5b9   :  { %1636 = vmatmul.mubr.msk.bf16.vlgmr.msra.gmra.mrb[36].mxu0 %vm278_vm2, %v814_v35  ;;  %1640 = vmatpush3.bf16.msra.mxu1 %v875_v41 }
 0x5ba   :  { %1641 = vmatprep.mubr.msk.bf16.mxu1 %vm1808_vm1, %v1807_v19  ;;  %1645 = vmatprep.subr.bf16.mxu1 %v1807_v19 }
 0x5bb   :  { %1673 = vmatprep.mubr.msk.bf16.mxu0 %vm1808_vm1, %v1807_v19  ;;  %1666 = vmatpush3.bf16.msra.mxu0 %v1723_v7 }
 0x5bc   :  { %1667 = vmatprep.subr.bf16.mxu0 %v1807_v19 }
 0x5bf   :  { %1668 = vmatpush3.bf16.msra.mxu0 %v1725_v18 }
 0x5c0   :  { %1642 = vmatmul.mubr.msk.bf16.vlgmr.msra.gmra.mrb[28].mxu1 %vm278_vm2, %v815_v53  ;;  %1669 = vmatprep.subr.bf16.mxu0 %v1807_v19 }
 0x5c1   :  { %1661 = vmatprep.mubr.msk.bf16.mxu1 %vm1808_vm1, %v1807_v19  ;;  %1646 = vmatpush3.bf16.msra.mxu1 %v1718_v56 }
 0x5c2   :  { %1647 = vmatprep.subr.bf16.mxu1 %v1807_v19 }
 0x5c3   :  { %1670 = vmatpush3.bf16.msra.mxu0 %v1727_v26 }
 0x5c4   :  { %1671 = vmatprep.subr.bf16.mxu0 %v1807_v19 }
 0x5c5   :  { %1648 = vmatpush3.bf16.msra.mxu1 %v1719_v57 }
 0x5c6   :  { %1649 = vmatprep.subr.bf16.mxu1 %v1807_v19 }
 0x5c7   :  { %1672 = vmatpush3.bf16.msra.mxu0 %v1729_v32 }
 0x5c9   :  { %1650 = vmatpush3.bf16.msra.mxu1 %v1720_v58 }
 0x5ca   :  { %1651 = vmatprep.subr.bf16.mxu1 %v1807_v19 }
 0x5cd   :  { %1652 = vmatpush3.bf16.msra.mxu1 %v1721_v4 }
 0x5ce   :  { %1653 = vmatprep.subr.bf16.mxu1 %v1807_v19 }
 0x5d1   :  { %1654 = vmatpush3.bf16.msra.mxu1 %v1722_v12 }
 0x5d2   :  { %1655 = vmatprep.subr.bf16.mxu1 %v1807_v19 }
 0x5d5   :  { %1656 = vmatpush3.bf16.msra.mxu1 %v1724_v17 }
 0x5d6   :  { %1657 = vmatprep.subr.bf16.mxu1 %v1807_v19 }
 0x5d9   :  { %1658 = vmatpush3.bf16.msra.mxu1 %v1726_v25 }
 0x5da   :  { %1659 = vmatprep.subr.bf16.mxu1 %v1807_v19 }
 0x5dd   :  { %1660 = vmatpush3.bf16.msra.mxu1 %v1728_v29 }
 0x674   :  { %v2189_v59 = vpop.f32.mrb[24].mxu0 }
 0x675   :  { %v1601_v61 = vpop.f32.mrb[25].mxu0 }
 0x676   :  { %v865_v63 = vpop.f32.mrb[26].mxu0 }
 0x677   :  { %v1602_v1 = vpop.f32.mrb[27].mxu0 }
 0x67b   :  { %v2191_v2 = vpop.f32.mrb[16].mxu1 }
 0x67c   :  { %v954_v8 = vpop.f32.mrb[28].mxu0  ;;  %v1607_v9 = vpop.f32.mrb[17].mxu1 }
 0x67d   :  { %v1613_v10 = vpop.f32.mrb[29].mxu0  ;;  %v914_v11 = vpop.f32.mrb[18].mxu1 }
 0x67e   :  { %v957_v13 = vpop.f32.mrb[30].mxu0  ;;  %v1608_v14 = vpop.f32.mrb[19].mxu1 }
 0x67f   :  { %v1614_v15 = vpop.f32.mrb[31].mxu0 }
 0x683   :  { %v997_v16 = vpop.f32.mrb[20].mxu1 }
 0x684   :  { %v1695_v20 = vpack.i.bf16 %v997_v16, %v954_v8  ;;  %v1040_v21 = vpop.f32.mrb[32].mxu0  ;;  %v1619_v22 = vpop.f32.mrb[21].mxu1 }
 0x685   :  { %v1625_v23 = vpop.f32.mrb[33].mxu0  ;;  %v1000_v24 = vpop.f32.mrb[22].mxu1 }
 0x686   :  { %v1043_v36 = vpop.f32.mrb[34].mxu0  ;;  %v1620_v27 = vpop.f32.mrb[23].mxu1  ;;  %1696 = vrot.lane.b32.xlu1 %v1695_v20, %s1819_s11 }
 0x687   :  { %v1626_v28 = vpop.f32.mrb[35].mxu0 }
 0x68b   :  { %v1083_v39 = vpop.f32.mrb[24].mxu1 }
 0x68c   :  { %v1700_v33 = vpack.i.bf16 %v1083_v39, %v1040_v21  ;;  %v1126_v60 = vpop.f32.mrb[36].mxu0  ;;  %v1631_v62 = vpop.f32.mrb[25].mxu1 }
 0x68d   :  { %v1637_v0 = vpop.f32.mrb[37].mxu0  ;;  %v1086_v34 = vpop.f32.mrb[26].mxu1 }
 0x68e   :  { %v1129_v30 = vpop.f32.mrb[38].mxu0  ;;  %v1632_v38 = vpop.f32.mrb[27].mxu1  ;;  %1701 = vrot.lane.b32.xlu1 %v1700_v33, %s1818_s6 }
 0x68f   :  { %v1638_v19 = vpop.f32.mrb[39].mxu0 }
 0x693   :  { %v1169_v40 = vpop.f32.mrb[28].mxu1 }
 0x694   :  { %v1705_v41 = vpack.i.bf16 %v1169_v40, %v1126_v60  ;;  %v1643_v42 = vpop.f32.mrb[29].mxu1 }
 0x695   :  { %v1172_v43 = vpop.f32.mrb[30].mxu1 }
 0x696   :  { %v1644_v44 = vpop.f32.mrb[31].mxu1  ;;  %1706 = vrot.lane.b32.xlu1 %v1705_v41, %s1817_s5  ;;  %s1782_s5 = scalar_lea.vmem %s1440_s4, 256 }
 0x697   :  { %p1783_p0 = scmp.ne.s32.totalorder %s1440_s4, %s1782_s5  ;;  %p1788_p2 = scmp.lt.s32.totalorder %s1782_s5, %s1782_s5 }
 0x699   :  { %p1789_p3 = por %p1788_p2, %p1787_p1 }
 0x69a   :  { %1269 = vrot.lane.b32.xlu1 %v1248_v6, %s1818_s6 }
 0x69b   :  { %p1790_p4 = pnand %p1789_p3, %p1783_p0 }
 0x6f8   :  { %v1697_v45 = vpop.permute.xlu1 %1696 }
 0x6f9   :  { %v1699_v31 = vunpack.i.h.bf16 %v1697_v45  ;;  %v1698_v37 = vunpack.i.l.bf16 %v1697_v45 }
 0x6fb   :  { %v1200_v50 = vsel %vm351_vm3, %v2191_v2, %v1699_v31  ;;  %v1199_v51 = vsel %vm351_vm3, %v2189_v59, %v1698_v37 }
 0x700   :  { %v1702_v46 = vpop.permute.xlu1 %1701 }
 0x701   :  { %v1704_v48 = vunpack.i.h.bf16 %v1702_v46  ;;  %v1703_v47 = vunpack.i.l.bf16 %v1702_v46 }
 0x703   :  { %v1202_v35 = vsel %vm36_vm0, %v1200_v50, %v1704_v48  ;;  %v1201_v3 = vsel %vm36_vm0, %v1199_v51, %v1703_v47 }
 0x708   :  { %v1707_v49 = vpop.permute.xlu1 %1706 }
 0x709   :  { %v1709_v52 = vunpack.i.h.bf16 %v1707_v49  ;;  %v1708_v54 = vunpack.i.l.bf16 %v1707_v49 }
 0x70b   :  { %v1205_v5 = vsel %vm1203_vm6, %v1202_v35, %v1709_v52  ;;  %v1204_v6 = vsel %vm1203_vm6, %v1201_v3, %v1708_v54 }
 0x70c   :  { %v1206_v53 = vpack.c.bf16 %v1205_v5, %v1204_v6  ;;  %v1270_v56 = vpop.permute.xlu1 %1269 }
 0x70d   :  { %v1272_v57 = vsel %vm36_vm0, %v1268_v55, %v1270_v56 }
 0x70e   :  { %1662 = vmatmul.mubr.bf16.vlgmr.msra.gmra.mrb[32].mxu1 %v1272_v57  ;;  %1674 = vmatmul.mubr.msk.bf16.vlgmr.msra.gmra.mrb[40].mxu0 %vm1387_vm7, %v1206_v53 }
 0x7e1   :  { %v1356_v58 = vpop.f32.mrb[32].mxu1  ;;  %v1425_v61 = vpop.f32.mrb[40].mxu0 }
 0x7e2   :  { %v1426_v59 = vadd.f32 %v1425_v61, %v1356_v58  ;;  %v1663_v63 = vpop.f32.mrb[33].mxu1  ;;  %v1675_v1 = vpop.f32.mrb[41].mxu0 }
 0x7e3   :  { %v1359_v2 = vpop.f32.mrb[34].mxu1  ;;  %v1428_v4 = vpop.f32.mrb[42].mxu0 }
 0x7e4   :  { %1432 = vst.msk [vmem:[#allocation2] sm:$0xff] %vm36_vm0, %v1426_v59  ;;  %v1429_v7 = vadd.f32 %v1428_v4, %v1359_v2  ;;  %v1664_v8 = vpop.f32.mrb[35].mxu1  ;;  %v1676_v9 = vpop.f32.mrb[43].mxu0 }
 0x7e6   :  { %1433 = vst.msk [vmem:[#allocation2 + $0x8] sm:$0xff] %vm36_vm0, %v1429_v7 }
 0x7e7   :  { %1793 = shalt.err (!%p1790_p4)
}
 0x7e8   :  { %s1794_s17 = scalar_lea.hbm %s2264_s9, 256 }
 0x7e9   :  { %p1795_p5 = scmp.ne.s32.totalorder %s2264_s9, %s1794_s17  ;;  %p1798_p6 = scmp.lt.u32.totalorder %s1794_s17, %s2264_s9 }
 0x7eb   :  { %p1800_p7 = pnand %p1798_p6, %p1795_p5 }
 0x7ed   :  { %1803 = shalt.err (!%p1800_p7)
}
 0x7ee   :  { %s1821_s22 = smov 128  }
 0x7ef   :  { %1445 = dma.vmem_to_hbm [thread:$0]  %s1440_s4, 256, %s2264_s9, [#allocation3], %s1821_s22, %s1821_s22, %s1816_s12  }
 0x7f0   :  { %1804 = dma.done.wait [#allocation3], 256  }
 0x7f1   :  { %1805 = vsyncadd [#allocation3], 4294967040 }
 0x7f2   :  { %1449 = vsyncpa [#allocation3], 1 }

</bundles_post_ra>
